<compile_context>
chip_gen: v7x
topology: tpu7x:2x2x1
jax: 0.10.0
libtpu: 0.0.40
codegen_flags: <defaults>
</compile_context>

<pallas_src>
import jax
import jax.numpy as jnp
from jax.experimental import pallas as pl
from jax.experimental.pallas import tpu as pltpu

_SUBLANE = 8


def _round_up(v, m):
    return -(-v // m) * m


def mlp_softmax_kernel(x_ref, w1_ref, b1_ref, w2_ref, b2_ref, w3_ref, b3_ref,
                       o_ref):
    # One batch tile per grid step; weights/biases are VMEM-resident across steps.
    x = x_ref[...]

    # linear1 + ReLU
    h1 = jnp.dot(x, w1_ref[...], preferred_element_type=jnp.float32)
    h1 = jnp.maximum(h1 + b1_ref[...], 0.0)

    # linear2 + ReLU
    h2 = jnp.dot(h1, w2_ref[...], preferred_element_type=jnp.float32)
    h2 = jnp.maximum(h2 + b2_ref[...], 0.0)

    # linear3 (logits)
    logits = jnp.dot(h2, w3_ref[...], preferred_element_type=jnp.float32)
    logits = logits + b3_ref[...]

    # softmax over last axis (nn.Softmax() on 2-D input defaults to dim=1),
    # max-subtracted for stability.  Exact division (NOT approx reciprocal) so
    # rows sum to 1; this kernel is DMA/overhead-bound, the divide is free.
    m = jnp.max(logits, axis=-1, keepdims=True)
    e = jnp.exp(logits - m)
    denom = jnp.sum(e, axis=-1, keepdims=True)
    o_ref[...] = (e / denom).astype(o_ref.dtype)


def _choose_batch_tile(B, F, h1, h2, n_out, x_itemsize,
                       target_x_block_bytes, working_set_bytes):
    """Rows per grid step: byte-budgeted, sublane-aligned, ragged-tail friendly."""
    if B <= _SUBLANE:
        return B  # single full-extent block (always layout-legal)

    # Approximate per-row VMEM working set for one tile:
    #   x stream (double-buffered) + f32 intermediates + out stream (double-buffered)
    per_row = (2 * F * x_itemsize
               + 4 * (h1 + h2 + 2 * n_out)
               + 2 * n_out * 4)
    tb = min(target_x_block_bytes // max(F * x_itemsize, 1),
             working_set_bytes // max(per_row, 1))
    tb = max(_SUBLANE, (tb // _SUBLANE) * _SUBLANE)
    # Never request a block (much) larger than the batch itself.
    tb = min(tb, _round_up(B, _SUBLANE))
    # Guarantee >= 2 grid steps when the batch is splittable so
    # dimension_semantics=("parallel",) can feed both v7x TensorCores.
    if B >= 2 * _SUBLANE:
        tb = min(tb, _round_up(pl.cdiv(B, 2), _SUBLANE))
    return tb


def torch_model_forward(x, params, *,
                        target_x_block_bytes=2 << 20,
                        working_set_bytes=10 << 20):
    """x: (B, input_size) -> softmax probabilities (B, 5)."""
    w1, b1, w2, b2, w3, b3 = params
    B, F = x.shape
    H1, H2, n_out = w1.shape[1], w2.shape[1], w3.shape[1]

    TB = _choose_batch_tile(B, F, H1, H2, n_out, x.dtype.itemsize,
                            target_x_block_bytes, working_set_bytes)
    grid = (pl.cdiv(B, TB),)  # ragged tail handled by Pallas; no jnp.pad copy

    # Weights/biases: full-array blocks with constant index_map -> fetched once,
    # resident in VMEM for the whole grid.
    def resident(a):
        return pl.BlockSpec(a.shape, lambda i: (0,) * a.ndim,
                            memory_space=pltpu.VMEM)

    # Advisory cost estimate for XLA's scheduler.
    flops = 2 * B * (F * H1 + H1 * H2 + H2 * n_out) + 10 * B * n_out
    param_bytes = sum(int(p.size) * p.dtype.itemsize for p in params)
    bytes_accessed = int(x.size) * x.dtype.itemsize + B * n_out * 4 + param_bytes
    cost = pl.CostEstimate(flops=int(flops),
                           transcendentals=int(B * n_out),
                           bytes_accessed=int(bytes_accessed))

    return pl.pallas_call(
        mlp_softmax_kernel,
        out_shape=jax.ShapeDtypeStruct((B, n_out), jnp.float32),
        grid_spec=pltpu.PrefetchScalarGridSpec(
            num_scalar_prefetch=0,
            grid=grid,
            in_specs=[pl.BlockSpec((TB, F), lambda i: (i, 0),
                                   memory_space=pltpu.VMEM),
                      resident(w1), resident(b1),
                      resident(w2), resident(b2),
                      resident(w3), resident(b3)],
            out_specs=pl.BlockSpec((TB, n_out), lambda i: (i, 0),
                                   memory_space=pltpu.VMEM)),
        compiler_params=pltpu.CompilerParams(
            dimension_semantics=("parallel",),
            vmem_limit_bytes=32 * 1024 * 1024),
        cost_estimate=cost,
    )(x, w1, b1, w2, b2, w3, b3)


def reference_forward(x, params):
    """Pure-JAX reference of the PyTorch forward (inference branch)."""
    w1, b1, w2, b2, w3, b3 = params
    h1 = jnp.maximum(x @ w1 + b1, 0.0)
    h2 = jnp.maximum(h1 @ w2 + b2, 0.0)
    logits = h2 @ w3 + b3
    return jax.nn.softmax(logits, axis=-1)


def init_params(key, input_size):
    """Deterministic init mimicking nn.Linear default (U[-1/sqrt(fan_in), +])."""
    def linear(key, fan_in, fan_out):
        kw, kb = jax.random.split(key)
        bound = 1.0 / jnp.sqrt(fan_in)
        # store weight as (in, out) so kernel computes x @ W
        w = jax.random.uniform(kw, (fan_in, fan_out), jnp.float32,
                               -bound, bound)
        b = jax.random.uniform(kb, (1, fan_out), jnp.float32, -bound, bound)
        return w, b

    k1, k2, k3 = jax.random.split(key, 3)
    w1, b1 = linear(k1, input_size, 32)
    w2, b2 = linear(k2, 32, 16)
    w3, b3 = linear(k3, 16, 5)
    return (w1, b1, w2, b2, w3, b3)


if __name__ == "__main__":
    key = jax.random.PRNGKey(0)
    k_p, k_x1, k_x2 = jax.random.split(key, 3)

    input_size = 32
    params = init_params(k_p, input_size)

    # Small batch: single full-extent block, grid=(1,).
    x_small = jax.random.normal(k_x1, (8, input_size), jnp.float32)
    # Ragged batch (not a multiple of the tile): exercises the no-pad path with
    # >=2 grid steps (megacore split) and a masked tail block.
    x_ragged = jax.random.normal(k_x2, (50, input_size), jnp.float32)

    for x_in in (x_small, x_ragged):
        probs = jax.block_until_ready(torch_model_forward(x_in, params))
        ref = reference_forward(x_in, params)
        assert probs.shape == ref.shape
        assert bool(jnp.all(jnp.isfinite(probs)))
        assert jnp.allclose(jnp.sum(probs, axis=-1), 1.0, atol=1e-4)
        assert jnp.allclose(probs, ref, atol=1e-4, rtol=1e-4)

    print("KERNEL_OK")
</pallas_src>

<mosaic_0001>
module attributes {stable_mosaic.version = 11 : i64} {
  func.func @mlp_softmax_kernel(%arg0: i32, %arg1: memref<8x32xf32, #tpu.memory_space<vmem>>, %arg2: memref<32x32xf32, #tpu.memory_space<vmem>>, %arg3: memref<1x32xf32, #tpu.memory_space<vmem>>, %arg4: memref<32x16xf32, #tpu.memory_space<vmem>>, %arg5: memref<1x16xf32, #tpu.memory_space<vmem>>, %arg6: memref<16x5xf32, #tpu.memory_space<vmem>>, %arg7: memref<1x5xf32, #tpu.memory_space<vmem>>, %arg8: memref<8x5xf32, #tpu.memory_space<vmem>>) attributes {dimension_semantics = [#tpu.dimension_semantics<parallel>], iteration_bounds = array<i64: 1>, scalar_prefetch = 0 : i64, scratch_operands = 0 : i64, tpu.core_type = #tpu.core_type<tc>, window_params = [{transform_indices = @transform_0, window_bounds = array<i64: 8, 32>}, {pipeline_mode = #tpu.pipeline_mode<synchronous>, transform_indices = @transform_1, window_bounds = array<i64: 32, 32>}, {pipeline_mode = #tpu.pipeline_mode<synchronous>, transform_indices = @transform_2, window_bounds = array<i64: 1, 32>}, {pipeline_mode = #tpu.pipeline_mode<synchronous>, transform_indices = @transform_3, window_bounds = array<i64: 32, 16>}, {pipeline_mode = #tpu.pipeline_mode<synchronous>, transform_indices = @transform_4, window_bounds = array<i64: 1, 16>}, {pipeline_mode = #tpu.pipeline_mode<synchronous>, transform_indices = @transform_5, window_bounds = array<i64: 16, 5>}, {pipeline_mode = #tpu.pipeline_mode<synchronous>, transform_indices = @transform_6, window_bounds = array<i64: 1, 5>}, {transform_indices = @transform_7, window_bounds = array<i64: 8, 5>}]} {
    %c0 = arith.constant 0 : index
    %c0_0 = arith.constant 0 : index
    %0 = vector.load %arg1[%c0, %c0_0] : memref<8x32xf32, #tpu.memory_space<vmem>>, vector<8x32xf32>
    %c0_1 = arith.constant 0 : index
    %c0_2 = arith.constant 0 : index
    %1 = vector.load %arg2[%c0_1, %c0_2] : memref<32x32xf32, #tpu.memory_space<vmem>>, vector<32x32xf32>
    %cst = arith.constant dense<0.000000e+00> : vector<8x32xf32>
    %2 = tpu.matmul %0, %1, %cst {dimension_numbers = #tpu.dot_dimension_numbers<[1], [0], [0], [1], [0, 0, 1, 1], [], []>} : vector<8x32xf32>, vector<32x32xf32>, vector<8x32xf32> -> vector<8x32xf32>
    %c0_3 = arith.constant 0 : index
    %c0_4 = arith.constant 0 : index
    %3 = vector.load %arg3[%c0_3, %c0_4] : memref<1x32xf32, #tpu.memory_space<vmem>>, vector<1x32xf32>
    %4 = vector.broadcast %3 : vector<1x32xf32> to vector<8x32xf32>
    %5 = arith.addf %2, %4 : vector<8x32xf32>
    %cst_5 = arith.constant 0.000000e+00 : f32
    %6 = vector.broadcast %cst_5 : f32 to vector<8x32xf32>
    %7 = arith.maximumf %5, %6 : vector<8x32xf32>
    %c0_6 = arith.constant 0 : index
    %c0_7 = arith.constant 0 : index
    %8 = vector.load %arg4[%c0_6, %c0_7] : memref<32x16xf32, #tpu.memory_space<vmem>>, vector<32x16xf32>
    %cst_8 = arith.constant dense<0.000000e+00> : vector<8x16xf32>
    %9 = tpu.matmul %7, %8, %cst_8 {dimension_numbers = #tpu.dot_dimension_numbers<[1], [0], [0], [1], [0, 0, 1, 1], [], []>} : vector<8x32xf32>, vector<32x16xf32>, vector<8x16xf32> -> vector<8x16xf32>
    %c0_9 = arith.constant 0 : index
    %c0_10 = arith.constant 0 : index
    %10 = vector.load %arg5[%c0_9, %c0_10] : memref<1x16xf32, #tpu.memory_space<vmem>>, vector<1x16xf32>
    %11 = vector.broadcast %10 : vector<1x16xf32> to vector<8x16xf32>
    %12 = arith.addf %9, %11 : vector<8x16xf32>
    %cst_11 = arith.constant 0.000000e+00 : f32
    %13 = vector.broadcast %cst_11 : f32 to vector<8x16xf32>
    %14 = arith.maximumf %12, %13 : vector<8x16xf32>
    %c0_12 = arith.constant 0 : index
    %c0_13 = arith.constant 0 : index
    %15 = vector.load %arg6[%c0_12, %c0_13] : memref<16x5xf32, #tpu.memory_space<vmem>>, vector<16x5xf32>
    %cst_14 = arith.constant dense<0.000000e+00> : vector<8x5xf32>
    %16 = tpu.matmul %14, %15, %cst_14 {dimension_numbers = #tpu.dot_dimension_numbers<[1], [0], [0], [1], [0, 0, 1, 1], [], []>} : vector<8x16xf32>, vector<16x5xf32>, vector<8x5xf32> -> vector<8x5xf32>
    %c0_15 = arith.constant 0 : index
    %c0_16 = arith.constant 0 : index
    %17 = vector.load %arg7[%c0_15, %c0_16] : memref<1x5xf32, #tpu.memory_space<vmem>>, vector<1x5xf32>
    %18 = vector.broadcast %17 : vector<1x5xf32> to vector<8x5xf32>
    %19 = arith.addf %16, %18 : vector<8x5xf32>
    %cst_17 = arith.constant dense<0xFF800000> : vector<8xf32>
    %20 = vector.multi_reduction <maximumf>, %19, %cst_17 [1] : vector<8x5xf32> to vector<8xf32>
    %21 = vector.shape_cast %20 : vector<8xf32> to vector<8x1xf32>
    %22 = vector.broadcast %21 : vector<8x1xf32> to vector<8x5xf32>
    %23 = arith.subf %19, %22 : vector<8x5xf32>
    %24 = math.exp %23 : vector<8x5xf32>
    %cst_18 = arith.constant dense<0.000000e+00> : vector<8xf32>
    %25 = vector.multi_reduction <add>, %24, %cst_18 [1] : vector<8x5xf32> to vector<8xf32>
    %26 = vector.shape_cast %25 : vector<8xf32> to vector<8x1xf32>
    %27 = vector.broadcast %26 : vector<8x1xf32> to vector<8x5xf32>
    %28 = arith.divf %24, %27 : vector<8x5xf32>
    %c0_19 = arith.constant 0 : index
    %c0_20 = arith.constant 0 : index
    %29 = vector.load %arg8[%c0_19, %c0_20] : memref<8x5xf32, #tpu.memory_space<vmem>>, vector<8x5xf32>
    tpu.vector_store %arg8[%c0_19, %c0_20], %28 {strides = array<i32>} : memref<8x5xf32, #tpu.memory_space<vmem>>, vector<8x5xf32>,
    return
  }
  func.func @transform_0(%arg0: i32) -> (i32, i32) {
    %c0_i32 = arith.constant 0 : i32
    %c0_i32_0 = arith.constant 0 : i32
    return %arg0, %c0_i32 : i32, i32
  }
  func.func @transform_1(%arg0: i32) -> (i32, i32) {
    %c0_i32 = arith.constant 0 : i32
    %c0_i32_0 = arith.constant 0 : i32
    %c0_i32_1 = arith.constant 0 : i32
    return %c0_i32, %c0_i32_0 : i32, i32
  }
  func.func @transform_2(%arg0: i32) -> (i32, i32) {
    %c0_i32 = arith.constant 0 : i32
    %c0_i32_0 = arith.constant 0 : i32
    %c0_i32_1 = arith.constant 0 : i32
    return %c0_i32, %c0_i32_0 : i32, i32
  }
  func.func @transform_3(%arg0: i32) -> (i32, i32) {
    %c0_i32 = arith.constant 0 : i32
    %c0_i32_0 = arith.constant 0 : i32
    %c0_i32_1 = arith.constant 0 : i32
    return %c0_i32, %c0_i32_0 : i32, i32
  }
  func.func @transform_4(%arg0: i32) -> (i32, i32) {
    %c0_i32 = arith.constant 0 : i32
    %c0_i32_0 = arith.constant 0 : i32
    %c0_i32_1 = arith.constant 0 : i32
    return %c0_i32, %c0_i32_0 : i32, i32
  }
  func.func @transform_5(%arg0: i32) -> (i32, i32) {
    %c0_i32 = arith.constant 0 : i32
    %c0_i32_0 = arith.constant 0 : i32
    %c0_i32_1 = arith.constant 0 : i32
    return %c0_i32, %c0_i32_0 : i32, i32
  }
  func.func @transform_6(%arg0: i32) -> (i32, i32) {
    %c0_i32 = arith.constant 0 : i32
    %c0_i32_0 = arith.constant 0 : i32
    %c0_i32_1 = arith.constant 0 : i32
    return %c0_i32, %c0_i32_0 : i32, i32
  }
  func.func @transform_7(%arg0: i32) -> (i32, i32) {
    %c0_i32 = arith.constant 0 : i32
    %c0_i32_0 = arith.constant 0 : i32
    return %arg0, %c0_i32 : i32, i32
  }
}

</mosaic_0001>

<bundles_post_ra>
// kernel: tpu_custom_call.1
= control target key start
LH: loop header
LB: loop body
LE: loop exit
PB: predicated region body
PF: predicated region fallthrough
CT: control target
= control target key end

     0   :  { %v404_v3 = vmov 0.0|0.0   ;;  %vm405_vm0 = vmmov 0   ;;  %v406_v6 = vmov 0.0   ;;  %s508_s0 = inlined_call_operand.vmem [shape: f32[8,32], index: 0, kind: input, shape index: {}]   ;;  %s509_s1 = inlined_call_operand.vmem [shape: f32[32,32], index: 1, kind: input, shape index: {}]   ;;  %s510_s2 = inlined_call_operand.vmem [shape: f32[1,32], index: 2, kind: input, shape index: {}]   ;;  %s511_s3 = inlined_call_operand.vmem [shape: f32[32,16], index: 3, kind: input, shape index: {}]   ;;  %s512_s4 = inlined_call_operand.vmem [shape: f32[1,16], index: 4, kind: input, shape index: {}]   ;;  %s513_s5 = inlined_call_operand.vmem [shape: f32[16,5], index: 5, kind: input, shape index: {}]   ;;  %s514_s6 = inlined_call_operand.vmem [shape: f32[1,5], index: 6, kind: input, shape index: {}]   ;;  %s515_s7 = inlined_call_operand.hbm [shape: f32[8,5], index: 7, kind: output, shape index: {}]  }
   0x1   :  { %v28_v0 = vld [vmem:[%s509_s1] sm:$0xff]  ;;  %v29_v1 = vld [vmem:[%s509_s1 + $0x8] sm:$0xff]  ;;  %v30_v2 = vld [vmem:[%s509_s1 + $0x10] sm:$0xff]  ;;  %357 = vmatprep.subr.bf16.mxu0 %v404_v3  ;;  %336 = vmatprep.mubr.msk.f32.mxu0 %vm405_vm0, %v406_v6 }
   0x2   :  { %v358_v4 = vpack.c.bf16 %v29_v1, %v28_v0  ;;  %v31_v5 = vld [vmem:[%s509_s1 + $0x18] sm:$0xff]  ;;  %v114_v7 = vld [vmem:[%s511_s3] sm:$0xff]  ;;  %363 = vmatprep.subr.bf16.mxu1 %v404_v3  ;;  %v115_v8 = vld [vmem:[%s511_s3 + $0x8] sm:$0xff]  ;;  %347 = vmatprep.mubr.msk.f32.mxu1 %vm405_vm0, %v406_v6 }
   0x3   :  { %12 = vsyncpa [#allocation3], 0  ;;  %v361_v9 = vpack.c.bf16 %v31_v5, %v30_v2  ;;  %v364_v10 = vpack.c.bf16 %v115_v8, %v114_v7  ;;  %v27_v11 = vld [vmem:[%s508_s0] sm:$0xff]  ;;  %vm39_vm1 = vcmask 261120   ;;  %v116_v12 = vld [vmem:[%s511_s3 + $0x10] sm:$0xff]  ;;  %vm208_vm2 = vcmask 130048  }
   0x4   :  { %359 = vmatpush3.bf16.msra.mxu0 %v358_v4  ;;  %v117_v13 = vld [vmem:[%s511_s3 + $0x18] sm:$0xff]  ;;  %v309_v15 = vld [vmem:[%s510_s2] ss:$0 sm:$0xff]  ;;  %v200_v21 = vld [vmem:[%s513_s5 + $0x8] sm:$0xff]  ;;  %vm282_vm3 = vcmask 39936  }
   0x5   :  { %360 = vmatprep.subr.bf16.mxu0 %v404_v3  ;;  %365 = vmatpush3.bf16.msra.mxu1 %v364_v10  ;;  %v367_v14 = vpack.c.bf16 %v117_v13, %v116_v12  ;;  %v199_v20 = vld [vmem:[%s513_s5] sm:$0xff] }
   0x6   :  { %366 = vmatprep.subr.bf16.mxu1 %v404_v3  ;;  %v370_v22 = vpack.c.bf16 %v200_v21, %v199_v20  ;;  %v311_v23 = vld [vmem:[%s512_s4] ss:$0 sm:$0xff]  ;;  %s407_s4 = smov [#allocation2]  }
   0x7   :  { %v313_v28 = vld [vmem:[%s514_s6] ss:$0 sm:$0xff]  ;;  %s301_s5 = sshll.u32 %s407_s4, 4  ;;  %s302_s5 = int_to_ptr.vmem [resolvable:$true] %s301_s5 }
   0x8   :  { %362 = vmatpush3.bf16.msra.mxu0 %v361_v9  ;;  %s380_s6 = scalar_lea.vmem %s302_s5, 128  ;;  %p385_p1 = scmp.lt.s32.totalorder %s302_s5, %s302_s5 }
   0x9   :  { %369 = vmatprep.subr.bf16.mxu0 %v404_v3  ;;  %368 = vmatpush3.bf16.msra.mxu1 %v367_v14  ;;  %p381_p0 = scmp.ne.s32.totalorder %s302_s5, %s380_s6  ;;  %p386_p2 = scmp.lt.s32.totalorder %s380_s6, %s380_s6 }
   0xb   :  { %337 = vmatmul.mubr.msk.f32.vlgmr.msra.gmra.mrb[0].mxu0 %vm39_vm1, %v27_v11  ;;  %p387_p3 = por %p386_p2, %p385_p1 }
   0xc   :  { %354 = vmatprep.mubr.msk.f32.mxu0 %vm405_vm0, %v406_v6  ;;  %371 = vmatpush3.bf16.msra.mxu0 %v370_v22 }
   0xd   :  { %p388_p4 = pnand %p387_p3, %p381_p0 }
  0xde   :  { %v109_v16 = vpop.f32.mrb[0].mxu0 }
  0xdf   :  { %v110_v17 = vadd.f32 %v309_v15, %v109_v16  ;;  %v338_v18 = vpop.f32.mrb[1].mxu0 }
  0xe1   :  { %v113_v19 = vmax.f32 %v110_v17, 0.0 }
  0xe3   :  { %348 = vmatmul.mubr.msk.f32.vlgmr.msra.gmra.mrb[0].mxu1 %vm39_vm1, %v113_v19 }
 0x1b6   :  { %v194_v24 = vpop.f32.mrb[0].mxu1 }
 0x1b7   :  { %v195_v25 = vadd.f32 %v311_v23, %v194_v24  ;;  %v349_v26 = vpop.f32.mrb[1].mxu1 }
 0x1b9   :  { %v198_v27 = vmax.f32 %v195_v25, 0.0 }
 0x1bb   :  { %355 = vmatmul.mubr.msk.f32.vlgmr.msra.gmra.mrb[2].mxu0 %vm208_vm2, %v198_v27 }
 0x28e   :  { %v278_v29 = vpop.f32.mrb[2].mxu0 }
 0x28f   :  { %v279_v30 = vadd.f32 %v313_v28, %v278_v29  ;;  %v356_v31 = vpop.f32.mrb[3].mxu0 }
 0x291   :  { %v283_v32 = vsel %vm282_vm3, %v279_v30, -inf }
 0x292   :  { %284 = vmax.xlane.f32.xlu0 %v283_v32 }
 0x31f   :  { %v285_v33 = vpop.xlane.xlu0 %284 }
 0x320   :  { %v286_v34 = vsub.f32 %v279_v30, %v285_v33 }
 0x322   :  { %v287_v35 = vmul.f32 1.442695, %v286_v34 }
 0x324   :  { %376 = vpow2.f32 %v287_v35 }
 0x32e   :  { %v377_v36 = vpop.eup %376 }
 0x32f   :  { %v289_v37 = vsel %vm282_vm3, %v377_v36, 0.0 }
 0x330   :  { %290 = vadd.xlane.f32.xlu0 %v289_v37 }
 0x3bd   :  { %v291_v38 = vpop.xlane.xlu0 %290 }
 0x3be   :  { %378 = vrcp.f32 %v291_v38 }
 0x3c8   :  { %v379_v39 = vpop.eup %378 }
 0x3c9   :  { %v293_v40 = vmul.f32 %v379_v39, %v377_v36 }
 0x3cb   :  { %294 = vst.msk [vmem:[#allocation2] sm:$0xff] %vm282_vm3, %v293_v40 }
 0x3cc   :  { %391 = shalt.err (!%p388_p4)
}
 0x3cd   :  { %s392_s27 = scalar_lea.hbm %s515_s7, 128 }
 0x3ce   :  { %p393_p5 = scmp.ne.s32.totalorder %s515_s7, %s392_s27  ;;  %p396_p6 = scmp.lt.u32.totalorder %s392_s27, %s515_s7 }
 0x3d0   :  { %p398_p7 = pnand %p396_p6, %p393_p5 }
 0x3d2   :  { %401 = shalt.err (!%p398_p7)
}
 0x3d3   :  { %304 = dma.vmem_to_hbm [thread:$0]  %s302_s5, 128, %s515_s7, [#allocation3]  }
 0x3d4   :  { %402 = dma.done.wait [#allocation3], 128  }
 0x3d5   :  { %403 = vsyncadd [#allocation3], 4294967168 }
 0x3d6   :  { %308 = vsyncpa [#allocation3], 1 }

</bundles_post_ra>
